<compile_context>
chip_gen: v7x
topology: tpu7x:2x2x1
jax: 0.10.0
libtpu: 0.0.40
codegen_flags: <defaults>
</compile_context>

<pallas_src>
import math

import jax
import jax.numpy as jnp
from jax.experimental import pallas as pl
from jax.experimental.pallas import tpu as pltpu

NUM_H2 = 512   # linear3 in_features
NUM_H3 = 100   # linear3 out_features
H3_PAD = 128   # 100 padded up to a full 128-lane width (lane-dense stores)


def linear_relu_kernel(x_ref, w_ref, b_ref, o_ref):
    """One batch tile: relu(x @ W + b). f32 operands, f32 MXU accumulation."""
    acc = jnp.dot(x_ref[...], w_ref[...], preferred_element_type=jnp.float32)
    o_ref[...] = jnp.maximum(acc + b_ref[...], 0.0)


def _round_up(n, m):
    return ((n + m - 1) // m) * m


def _pick_batch_tile(batch):
    # HBM-bound GEMM: big tiles amortize the per-grid-step overhead, but keep
    # >= ~4 grid steps so v7x's 2 TensorCores both get work.  Always 8-sublane
    # aligned, capped at 2048 rows (~6-7 MiB double-buffered with the output,
    # fits comfortably inside every generation's scoped VMEM at 32 MiB).
    tb = _round_up(max(1, pl.cdiv(batch, 4)), 8)
    return max(8, min(2048, tb))


@jax.jit
def forward_h2_h3(x, weight, bias):
    """Equivalent of the PyTorch module: relu(linear3(x.float())).

    Args:
      x:      (batch, 512) input (any float dtype; cast like x.float()).
      weight: (100, 512) PyTorch-layout linear weight.
      bias:   (100,) linear bias.
    Returns:
      (batch, 100) float32.
    """
    x = x.astype(jnp.float32)            # x.float(); no-op if already f32
    batch = x.shape[0]

    # Pack weights (tiny, one-off): (100, 512) -> transpose -> zero-pad output
    # columns to 128.  Zero bias padding + ReLU(0)=0 keeps the padded columns
    # exactly zero, so slicing them off is exact.
    w_packed = jnp.zeros((NUM_H2, H3_PAD), jnp.float32).at[:, :NUM_H3].set(
        weight.astype(jnp.float32).T)
    b_packed = jnp.zeros((1, H3_PAD), jnp.float32).at[:, :NUM_H3].set(
        bias.astype(jnp.float32).reshape(1, NUM_H3))

    tb = _pick_batch_tile(batch)
    grid = (pl.cdiv(batch, tb),)          # ragged last block handled by Pallas

    cost = pl.CostEstimate(
        flops=2 * batch * NUM_H2 * H3_PAD,
        transcendentals=0,
        bytes_accessed=(batch * NUM_H2 * 4        # x read
                        + NUM_H2 * H3_PAD * 4     # W read (once, resident)
                        + H3_PAD * 4              # bias
                        + batch * H3_PAD * 4),    # output write
    )

    out_padded = pl.pallas_call(
        linear_relu_kernel,
        out_shape=jax.ShapeDtypeStruct((batch, H3_PAD), jnp.float32),
        grid_spec=pltpu.PrefetchScalarGridSpec(
            num_scalar_prefetch=0,
            grid=grid,
            in_specs=[
                # x: new batch tile each grid step (pipelined DMA), read
                # directly from HBM in f32 — no wrapper cast/pad passes.
                pl.BlockSpec((tb, NUM_H2), lambda i: (i, 0)),
                # Weights / bias: constant index map -> fetched once, resident.
                pl.BlockSpec((NUM_H2, H3_PAD), lambda i: (0, 0)),
                pl.BlockSpec((1, H3_PAD), lambda i: (0, 0)),
            ],
            out_specs=pl.BlockSpec((tb, H3_PAD), lambda i: (i, 0)),
        ),
        compiler_params=pltpu.CompilerParams(
            # Batch axis is embarrassingly parallel -> shard across v7x's 2 TCs.
            dimension_semantics=("parallel",),
            vmem_limit_bytes=32 * 1024 * 1024,
        ),
        cost_estimate=cost,
    )(x, w_packed, b_packed)

    # Only the 28 zero-padded output columns are dropped (batch is un-padded);
    # XLA fuses this slice into the consumer.  Callers that can consume the
    # 128-wide slab should use out_padded directly.
    return out_padded[:, :NUM_H3]


if __name__ == "__main__":
    key = jax.random.PRNGKey(0)
    kx, kw, kb, kx2 = jax.random.split(key, 4)

    # nn.Linear(512, 100) default init: U(-1/sqrt(512), 1/sqrt(512)).
    bound = 1.0 / math.sqrt(NUM_H2)
    weight = jax.random.uniform(kw, (NUM_H3, NUM_H2), jnp.float32, -bound, bound)
    bias = jax.random.uniform(kb, (NUM_H3,), jnp.float32, -bound, bound)

    def ref(xv):
        return jnp.maximum(
            jnp.dot(xv, weight.T, precision=jax.lax.Precision.HIGHEST) + bias,
            0.0)

    # Tile-aligned small batch.
    batch = 8
    x = jax.random.normal(kx, (batch, NUM_H2), jnp.float32)
    out = jax.block_until_ready(forward_h2_h3(x, weight, bias))
    assert out.shape == (batch, NUM_H3)
    assert jnp.allclose(out, ref(x), atol=2e-3, rtol=2e-3), "aligned-batch mismatch"

    # Ragged batch (partial last grid block): verifies OOB rows of the last x
    # block only feed output rows that Pallas clips on store.
    batch2 = 13
    x2 = jax.random.normal(kx2, (batch2, NUM_H2), jnp.float32)
    out2 = jax.block_until_ready(forward_h2_h3(x2, weight, bias))
    assert out2.shape == (batch2, NUM_H3)
    assert jnp.allclose(out2, ref(x2), atol=2e-3, rtol=2e-3), "ragged-batch mismatch"

    print("KERNEL_OK")
</pallas_src>

<mosaic_0001>
module attributes {stable_mosaic.version = 11 : i64} {
  func.func @linear_relu_kernel(%arg0: i32, %arg1: memref<8x512xf32, #tpu.memory_space<vmem>>, %arg2: memref<512x128xf32, #tpu.memory_space<vmem>>, %arg3: memref<1x128xf32, #tpu.memory_space<vmem>>, %arg4: memref<8x128xf32, #tpu.memory_space<vmem>>) attributes {dimension_semantics = [#tpu.dimension_semantics<parallel>], iteration_bounds = array<i64: 1>, scalar_prefetch = 0 : i64, scratch_operands = 0 : i64, tpu.core_type = #tpu.core_type<tc>, window_params = [{transform_indices = @transform_0, window_bounds = array<i64: 8, 512>}, {pipeline_mode = #tpu.pipeline_mode<synchronous>, transform_indices = @transform_1, window_bounds = array<i64: 512, 128>}, {pipeline_mode = #tpu.pipeline_mode<synchronous>, transform_indices = @transform_2, window_bounds = array<i64: 1, 128>}, {transform_indices = @transform_3, window_bounds = array<i64: 8, 128>}]} {
    %c0 = arith.constant 0 : index
    %c0_0 = arith.constant 0 : index
    %0 = vector.load %arg1[%c0, %c0_0] : memref<8x512xf32, #tpu.memory_space<vmem>>, vector<8x512xf32>
    %c0_1 = arith.constant 0 : index
    %c0_2 = arith.constant 0 : index
    %1 = vector.load %arg2[%c0_1, %c0_2] : memref<512x128xf32, #tpu.memory_space<vmem>>, vector<512x128xf32>
    %cst = arith.constant dense<0.000000e+00> : vector<8x128xf32>
    %2 = tpu.matmul %0, %1, %cst {dimension_numbers = #tpu.dot_dimension_numbers<[1], [0], [0], [1], [0, 0, 1, 1], [], []>} : vector<8x512xf32>, vector<512x128xf32>, vector<8x128xf32> -> vector<8x128xf32>
    %c0_3 = arith.constant 0 : index
    %c0_4 = arith.constant 0 : index
    %3 = vector.load %arg3[%c0_3, %c0_4] : memref<1x128xf32, #tpu.memory_space<vmem>>, vector<1x128xf32>
    %4 = vector.broadcast %3 : vector<1x128xf32> to vector<8x128xf32>
    %5 = arith.addf %2, %4 : vector<8x128xf32>
    %cst_5 = arith.constant 0.000000e+00 : f32
    %6 = vector.broadcast %cst_5 : f32 to vector<8x128xf32>
    %7 = arith.maximumf %5, %6 : vector<8x128xf32>
    %c0_6 = arith.constant 0 : index
    %c0_7 = arith.constant 0 : index
    %8 = vector.load %arg4[%c0_6, %c0_7] : memref<8x128xf32, #tpu.memory_space<vmem>>, vector<8x128xf32>
    tpu.vector_store %arg4[%c0_6, %c0_7], %7 {strides = array<i32>} : memref<8x128xf32, #tpu.memory_space<vmem>>, vector<8x128xf32>,
    return
  }
  func.func @transform_0(%arg0: i32) -> (i32, i32) {
    %c0_i32 = arith.constant 0 : i32
    %c0_i32_0 = arith.constant 0 : i32
    return %arg0, %c0_i32 : i32, i32
  }
  func.func @transform_1(%arg0: i32) -> (i32, i32) {
    %c0_i32 = arith.constant 0 : i32
    %c0_i32_0 = arith.constant 0 : i32
    %c0_i32_1 = arith.constant 0 : i32
    return %c0_i32, %c0_i32_0 : i32, i32
  }
  func.func @transform_2(%arg0: i32) -> (i32, i32) {
    %c0_i32 = arith.constant 0 : i32
    %c0_i32_0 = arith.constant 0 : i32
    %c0_i32_1 = arith.constant 0 : i32
    return %c0_i32, %c0_i32_0 : i32, i32
  }
  func.func @transform_3(%arg0: i32) -> (i32, i32) {
    %c0_i32 = arith.constant 0 : i32
    %c0_i32_0 = arith.constant 0 : i32
    return %arg0, %c0_i32 : i32, i32
  }
}

</mosaic_0001>

<bundles_post_ra>
// kernel: forward_h2_h3.1
= control target key start
LH: loop header
LB: loop body
LE: loop exit
PB: predicated region body
PF: predicated region fallthrough
CT: control target
= control target key end

     0   :  { %s646_s0 = inlined_call_operand.vmem [shape: f32[8,512], index: 0, kind: input, shape index: {}]   ;;  %s647_s1 = inlined_call_operand.vmem [shape: f32[512,128], index: 1, kind: input, shape index: {}]   ;;  %s648_s2 = inlined_call_operand.vmem [shape: f32[1,128], index: 2, kind: input, shape index: {}]   ;;  %s649_s3 = inlined_call_operand.hbm [shape: f32[8,128], index: 3, kind: output, shape index: {}]  }
   0x1   :  { %v35_v0 = vld [vmem:[%s647_s1 + $0x80] sm:$0xff]  ;;  %v36_v1 = vld [vmem:[%s647_s1 + $0x88] sm:$0xff]  ;;  %v37_v11 = vld [vmem:[%s647_s1 + $0x90] sm:$0xff] }
   0x2   :  { %v19_v2 = vld [vmem:[%s647_s1] sm:$0xff]  ;;  %v317_v3 = vpack.c.bf16 %v36_v1, %v35_v0  ;;  %v20_v4 = vld [vmem:[%s647_s1 + $0x8] sm:$0xff]  ;;  %v38_v13 = vld [vmem:[%s647_s1 + $0x98] sm:$0xff] }
   0x3   :  { %v67_v5 = vld [vmem:[%s647_s1 + $0x180] sm:$0xff]  ;;  %v68_v6 = vld [vmem:[%s647_s1 + $0x188] sm:$0xff]  ;;  %v319_v7 = vpack.c.bf16 %v20_v4, %v19_v2  ;;  %v21_v14 = vld [vmem:[%s647_s1 + $0x10] sm:$0xff]  ;;  %v321_v16 = vpack.c.bf16 %v38_v13, %v37_v11 }
   0x4   :  { %v349_v8 = vpack.c.bf16 %v68_v6, %v67_v5  ;;  %v51_v9 = vld [vmem:[%s647_s1 + $0x100] sm:$0xff]  ;;  %v52_v10 = vld [vmem:[%s647_s1 + $0x108] sm:$0xff]  ;;  %318 = vmatprep.subr.bf16.mxu0 %v317_v3  ;;  %v22_v15 = vld [vmem:[%s647_s1 + $0x18] sm:$0xff] }
   0x5   :  { %v351_v12 = vpack.c.bf16 %v52_v10, %v51_v9  ;;  %320 = vmatpush3.bf16.msra.mxu0 %v319_v7  ;;  %v323_v17 = vpack.c.bf16 %v22_v15, %v21_v14  ;;  %v69_v18 = vld [vmem:[%s647_s1 + $0x190] sm:$0xff]  ;;  %v70_v19 = vld [vmem:[%s647_s1 + $0x198] sm:$0xff]  ;;  %v39_v23 = vld [vmem:[%s647_s1 + $0xa0] sm:$0xff] }
   0x6   :  { %350 = vmatprep.subr.bf16.mxu1 %v349_v8  ;;  %v53_v20 = vld [vmem:[%s647_s1 + $0x110] sm:$0xff]  ;;  %v353_v21 = vpack.c.bf16 %v70_v19, %v69_v18  ;;  %v54_v22 = vld [vmem:[%s647_s1 + $0x118] sm:$0xff]  ;;  %v40_v24 = vld [vmem:[%s647_s1 + $0xa8] sm:$0xff]  ;;  %322 = vmatprep.subr.bf16.mxu0 %v321_v16 }
   0x7   :  { %352 = vmatpush3.bf16.msra.mxu1 %v351_v12  ;;  %v355_v25 = vpack.c.bf16 %v54_v22, %v53_v20  ;;  %v325_v26 = vpack.c.bf16 %v40_v24, %v39_v23  ;;  %v23_v27 = vld [vmem:[%s647_s1 + $0x20] sm:$0xff]  ;;  %v24_v28 = vld [vmem:[%s647_s1 + $0x28] sm:$0xff]  ;;  %v41_v35 = vld [vmem:[%s647_s1 + $0xb0] sm:$0xff] }
   0x8   :  { %v71_v29 = vld [vmem:[%s647_s1 + $0x1a0] sm:$0xff]  ;;  %354 = vmatprep.subr.bf16.mxu1 %v353_v21  ;;  %v72_v30 = vld [vmem:[%s647_s1 + $0x1a8] sm:$0xff]  ;;  %v327_v33 = vpack.c.bf16 %v24_v28, %v23_v27  ;;  %v42_v36 = vld [vmem:[%s647_s1 + $0xb8] sm:$0xff] }
   0x9   :  { %v55_v31 = vld [vmem:[%s647_s1 + $0x120] sm:$0xff]  ;;  %v56_v32 = vld [vmem:[%s647_s1 + $0x128] sm:$0xff]  ;;  %324 = vmatpush3.bf16.msra.mxu0 %v323_v17  ;;  %v357_v34 = vpack.c.bf16 %v72_v30, %v71_v29  ;;  %v25_v37 = vld [vmem:[%s647_s1 + $0x30] sm:$0xff]  ;;  %v329_v39 = vpack.c.bf16 %v42_v36, %v41_v35 }
   0xa   :  { %326 = vmatprep.subr.bf16.mxu0 %v325_v26  ;;  %v359_v38 = vpack.c.bf16 %v56_v32, %v55_v31  ;;  %v26_v40 = vld [vmem:[%s647_s1 + $0x38] sm:$0xff]  ;;  %v73_v41 = vld [vmem:[%s647_s1 + $0x1b0] sm:$0xff]  ;;  %v43_v46 = vld [vmem:[%s647_s1 + $0xc0] sm:$0xff] }
   0xb   :  { %356 = vmatpush3.bf16.msra.mxu1 %v355_v25  ;;  %v74_v42 = vld [vmem:[%s647_s1 + $0x1b8] sm:$0xff]  ;;  %v57_v44 = vld [vmem:[%s647_s1 + $0x130] sm:$0xff]  ;;  %v44_v47 = vld [vmem:[%s647_s1 + $0xc8] sm:$0xff]  ;;  %v331_v48 = vpack.c.bf16 %v26_v40, %v25_v37 }
   0xc   :  { %358 = vmatprep.subr.bf16.mxu1 %v357_v34  ;;  %v361_v43 = vpack.c.bf16 %v74_v42, %v73_v41  ;;  %v58_v45 = vld [vmem:[%s647_s1 + $0x138] sm:$0xff]  ;;  %v75_v49 = vld [vmem:[%s647_s1 + $0x1c0] sm:$0xff]  ;;  %v76_v50 = vld [vmem:[%s647_s1 + $0x1c8] sm:$0xff]  ;;  %v333_v52 = vpack.c.bf16 %v44_v47, %v43_v46 }
   0xd   :  { %328 = vmatpush3.bf16.msra.mxu0 %v327_v33  ;;  %v363_v51 = vpack.c.bf16 %v58_v45, %v57_v44  ;;  %v27_v53 = vld [vmem:[%s647_s1 + $0x40] sm:$0xff]  ;;  %v28_v54 = vld [vmem:[%s647_s1 + $0x48] sm:$0xff]  ;;  %v365_v56 = vpack.c.bf16 %v76_v50, %v75_v49  ;;  %v45_v58 = vld [vmem:[%s647_s1 + $0xd0] sm:$0xff] }
   0xe   :  { %330 = vmatprep.subr.bf16.mxu0 %v329_v39  ;;  %v59_v55 = vld [vmem:[%s647_s1 + $0x140] sm:$0xff]  ;;  %v60_v57 = vld [vmem:[%s647_s1 + $0x148] sm:$0xff]  ;;  %v46_v59 = vld [vmem:[%s647_s1 + $0xd8] sm:$0xff]  ;;  %v335_v62 = vpack.c.bf16 %v28_v54, %v27_v53 }
   0xf   :  { %360 = vmatpush3.bf16.msra.mxu1 %v359_v38  ;;  %v77_v60 = vld [vmem:[%s647_s1 + $0x1d0] sm:$0xff]  ;;  %v78_v61 = vld [vmem:[%s647_s1 + $0x1d8] sm:$0xff]  ;;  %v367_v63 = vpack.c.bf16 %v60_v57, %v59_v55  ;;  %v337_v0 = vpack.c.bf16 %v46_v59, %v45_v58  ;;  %v47_v6 = vld [vmem:[%s647_s1 + $0xe0] sm:$0xff] }
  0x10   :  { %362 = vmatprep.subr.bf16.mxu1 %v361_v43  ;;  %v29_v1 = vld [vmem:[%s647_s1 + $0x50] sm:$0xff]  ;;  %v30_v2 = vld [vmem:[%s647_s1 + $0x58] sm:$0xff]  ;;  %v369_v4 = vpack.c.bf16 %v78_v61, %v77_v60  ;;  %v48_v7 = vld [vmem:[%s647_s1 + $0xe8] sm:$0xff] }
  0x11   :  { %332 = vmatpush3.bf16.msra.mxu0 %v331_v48  ;;  %v61_v3 = vld [vmem:[%s647_s1 + $0x150] sm:$0xff]  ;;  %v62_v5 = vld [vmem:[%s647_s1 + $0x158] sm:$0xff]  ;;  %v79_v8 = vld [vmem:[%s647_s1 + $0x1e0] sm:$0xff]  ;;  %v339_v10 = vpack.c.bf16 %v30_v2, %v29_v1  ;;  %v341_v15 = vpack.c.bf16 %v48_v7, %v47_v6 }
  0x12   :  { %334 = vmatprep.subr.bf16.mxu0 %v333_v52  ;;  %v80_v9 = vld [vmem:[%s647_s1 + $0x1e8] sm:$0xff]  ;;  %v31_v11 = vld [vmem:[%s647_s1 + $0x60] sm:$0xff]  ;;  %v371_v14 = vpack.c.bf16 %v62_v5, %v61_v3  ;;  %v49_v17 = vld [vmem:[%s647_s1 + $0xf0] sm:$0xff] }
  0x13   :  { %364 = vmatpush3.bf16.msra.mxu1 %v363_v51  ;;  %v32_v12 = vld [vmem:[%s647_s1 + $0x68] sm:$0xff]  ;;  %v63_v13 = vld [vmem:[%s647_s1 + $0x160] sm:$0xff]  ;;  %v373_v19 = vpack.c.bf16 %v80_v9, %v79_v8  ;;  %v50_v20 = vld [vmem:[%s647_s1 + $0xf8] sm:$0xff] }
  0x14   :  { %366 = vmatprep.subr.bf16.mxu1 %v365_v56  ;;  %v64_v16 = vld [vmem:[%s647_s1 + $0x168] sm:$0xff]  ;;  %v18_v21 = vld [vmem:[%s646_s0 + $0x18] sm:$0xff] }
  0x15   :  { %336 = vmatpush3.bf16.msra.mxu0 %v335_v62  ;;  %v16_v18 = vld [vmem:[%s646_s0 + $0x8] sm:$0xff] }
  0x16   :  { %338 = vmatprep.subr.bf16.mxu0 %v337_v0  ;;  %154 = vmatprep.mubr.f32.mxu0 %v16_v18 }
  0x17   :  { %368 = vmatpush3.bf16.msra.mxu1 %v367_v63 }
  0x18   :  { %370 = vmatprep.subr.bf16.mxu1 %v369_v4 }
  0x19   :  { %8 = vsyncpa [#allocation3], 0  ;;  %v81_v22 = vld [vmem:[%s647_s1 + $0x1f0] sm:$0xff]  ;;  %v82_v23 = vld [vmem:[%s647_s1 + $0x1f8] sm:$0xff]  ;;  %224 = vmatprep.mubr.f32.mxu1 %v18_v21  ;;  %340 = vmatpush3.bf16.msra.mxu0 %v339_v10  ;;  %v343_v24 = vpack.c.bf16 %v32_v12, %v31_v11  ;;  %v375_v25 = vpack.c.bf16 %v64_v16, %v63_v13  ;;  %v345_v26 = vpack.c.bf16 %v50_v20, %v49_v17  ;;  %s406_s14 = smov [#allocation2]  }
  0x1a   :  { %342 = vmatprep.subr.bf16.mxu0 %v341_v15  ;;  %v33_v27 = vld [vmem:[%s647_s1 + $0x70] sm:$0xff]  ;;  %v34_v28 = vld [vmem:[%s647_s1 + $0x78] sm:$0xff]  ;;  %v377_v29 = vpack.c.bf16 %v82_v23, %v81_v22  ;;  %v15_v34 = vld [vmem:[%s646_s0] sm:$0xff]  ;;  %s238_s15 = sshll.u32 %s406_s14, 4  ;;  %s239_s15 = int_to_ptr.vmem [resolvable:$true] %s238_s15 }
  0x1b   :  { %372 = vmatpush3.bf16.msra.mxu1 %v371_v14  ;;  %v65_v30 = vld [vmem:[%s647_s1 + $0x170] sm:$0xff]  ;;  %v66_v31 = vld [vmem:[%s647_s1 + $0x178] sm:$0xff]  ;;  %v347_v32 = vpack.c.bf16 %v34_v28, %v33_v27  ;;  %v246_v37 = vld [vmem:[%s648_s2] ss:$0 sm:$0xff]  ;;  %p387_p1 = scmp.lt.s32.totalorder %s239_s15, %s239_s15 }
  0x1c   :  { %374 = vmatprep.subr.bf16.mxu1 %v373_v19  ;;  %v379_v33 = vpack.c.bf16 %v66_v31, %v65_v30  ;;  %v17_v35 = vld [vmem:[%s646_s0 + $0x10] sm:$0xff]  ;;  %s382_s0 = scalar_lea.vmem %s239_s15, 128 }
  0x1d   :  { %344 = vmatpush3.bf16.msra.mxu0 %v343_v24  ;;  %p383_p0 = scmp.ne.s32.totalorder %s239_s15, %s382_s0  ;;  %p388_p2 = scmp.lt.s32.totalorder %s382_s0, %s382_s0 }
  0x1e   :  { %346 = vmatprep.subr.bf16.mxu0 %v345_v26 }
  0x1f   :  { %376 = vmatpush3.bf16.msra.mxu1 %v375_v25  ;;  %p389_p3 = por %p388_p2, %p387_p1 }
  0x20   :  { %378 = vmatprep.subr.bf16.mxu1 %v377_v29 }
  0x21   :  { %348 = vmatpush3.bf16.msra.mxu0 %v347_v32  ;;  %p390_p4 = pnand %p389_p3, %p383_p0 }
  0x23   :  { %380 = vmatpush3.bf16.msra.mxu1 %v379_v33 }
  0x24   :  { %155 = vmatmul.mubr.f32.vlgmr.msra.gmra.mrb[0].mxu0 %v15_v34 }
  0x26   :  { %225 = vmatmul.mubr.f32.vlgmr.msra.gmra.mrb[0].mxu1 %v17_v35 }
  0xf7   :  { %v279_v36 = vpop.f32.mrb[0].mxu0 }
  0xf8   :  { %v280_v38 = vpop.f32.mrb[1].mxu0 }
  0xf9   :  { %v314_v39 = vpop.f32.mrb[0].mxu1  ;;  %v281_v40 = vadd.f32 %v280_v38, %v279_v36 }
  0xfa   :  { %v315_v41 = vpop.f32.mrb[1].mxu1 }
  0xfb   :  { %v316_v42 = vadd.f32 %v315_v41, %v314_v39  ;;  %v157_v43 = vadd.f32 %v281_v40, %v246_v37 }
  0xfd   :  { %v227_v44 = vadd.f32 %v316_v42, %v157_v43 }
  0xff   :  { %v230_v45 = vmax.f32 %v227_v44, 0.0 }
 0x101   :  { %231 = vst [vmem:[#allocation2] sm:$0xff] %v230_v45 }
 0x102   :  { %393 = shalt.err (!%p390_p4)
}
 0x103   :  { %s394_s17 = scalar_lea.hbm %s649_s3, 128 }
 0x104   :  { %p395_p5 = scmp.ne.s32.totalorder %s649_s3, %s394_s17  ;;  %p398_p6 = scmp.lt.u32.totalorder %s394_s17, %s649_s3 }
 0x106   :  { %p400_p7 = pnand %p398_p6, %p395_p5 }
 0x108   :  { %403 = shalt.err (!%p400_p7)
}
 0x109   :  { %241 = dma.vmem_to_hbm [thread:$0]  %s239_s15, 128, %s649_s3, [#allocation3]  }
 0x10a   :  { %404 = dma.done.wait [#allocation3], 128  }
 0x10b   :  { %405 = vsyncadd [#allocation3], 4294967168 }
 0x10c   :  { %245 = vsyncpa [#allocation3], 1 }

</bundles_post_ra>
